<compile_context>
chip_gen: v5e
topology: v5e:2x2
jax: 0.10.0
libtpu: 0.0.40
codegen_flags: <defaults>
</compile_context>

<pallas_src>
import functools

import jax
import jax.numpy as jnp
from jax.experimental import pallas as pl
from jax.experimental.pallas import tpu as pltpu

LN_EPS = 1e-5  # PyTorch nn.LayerNorm default


def _round_up(x, m):
    return ((x + m - 1) // m) * m


def _tva_fusion_kernel(xt_ref, xv_ref, xa_ref, w_ref, b_ref, s_ref,
                       all_ref, sds_ref, common_ref, *, Up, B):
    """Fused 6-head projection: LayerNorm(D) -> Linear(D, U) -> Tanh, all heads.

    Shapes (single invocation, everything resident in VMEM):
      xt/xv/xa_ref: (B, D)          text / vision / audio embeddings
      w_ref:        (3, D, 2*Up)    per-modality folded weights, lanes = [simi | dissimi]
      b_ref:        (3, 1, 2*Up)    per-modality folded biases (f32)
      s_ref:        (3, 1, 2*Up)    per-output-column dequant scales (only used for int8)
      all_ref:      (B, 6*Up)       x1_all   = [T_s | V_s | A_s | T_d | V_d | A_d]
      sds_ref:      (6*B, Up)       x1_sds   = [T_s; V_s; A_s; T_d; V_d; A_d]
      common_ref:   (B, Up)         common_feature = T_s + V_s + A_s
    """
    x_refs = (xt_ref, xv_ref, xa_ref)
    is_int_w = jnp.issubdtype(w_ref.dtype, jnp.integer)
    # Static unroll over the 3 modalities: the simi & dissimi heads of a modality share
    # the same LayerNorm statistics (affine folded into W/b), so each embedding is
    # normalized once and fed to a single (B,D)@(D,2*Up) matmul.
    for m in range(3):
        x = x_refs[m][...].astype(jnp.float32)                   # (B, D)
        mean = jnp.mean(x, axis=-1, keepdims=True)
        xc = x - mean
        var = jnp.mean(xc * xc, axis=-1, keepdims=True)
        xn = xc * jax.lax.rsqrt(var + LN_EPS)                    # LN affine folded away

        w_m = w_ref[m]                                           # (D, 2*Up)
        if is_int_w:
            # int8 weights: HBM/DMA is the win; dequantize in VMEM, matmul in f32.
            y = jnp.dot(xn, w_m.astype(jnp.float32),
                        preferred_element_type=jnp.float32)
            y = y * s_ref[m]                                     # per-column scale
        else:
            y = jnp.dot(xn.astype(w_ref.dtype), w_m,
                        preferred_element_type=jnp.float32)      # f32 MXU accumulate
        y = jnp.tanh(y + b_ref[m])                               # (B, 2*Up), f32
        # Dropout: module evaluated in inference mode -> identity.
        # TODO(synk): training-mode dropout would need pltpu.prng_seed/prng_random_bits
        # and the gamma/beta folding redone per step (LN params are trainable).

        y_s = y[:, :Up]
        y_d = y[:, Up:]

        # x1_all slab (lane-dense, unmasked stores when Up % 128 == 0).
        all_ref[:, m * Up:(m + 1) * Up] = y_s.astype(all_ref.dtype)        # simi
        all_ref[:, (3 + m) * Up:(4 + m) * Up] = y_d.astype(all_ref.dtype)  # dissimi
        # x1_sds stacked along batch (dim 0), same order as torch.cat(..., dim=0).
        sds_ref[m * B:(m + 1) * B, :] = y_s.astype(sds_ref.dtype)
        sds_ref[(3 + m) * B:(4 + m) * B, :] = y_d.astype(sds_ref.dtype)
        # common_feature = T_s + V_s + A_s, accumulated in the output ref.
        if m == 0:
            common_ref[...] = y_s.astype(common_ref.dtype)
        else:
            common_ref[...] = common_ref[...] + y_s.astype(common_ref.dtype)


def prepare_params(params, weight_mode="bfloat16"):
    """Offline (inference-time) constant folding / packing of the six projection heads.

    Folds LayerNorm affine into the Linear layer:
        y = LN_affine(xn) @ W + b  ==  xn @ (gamma[:,None] * W) + (beta @ W + b)
    regroups heads per modality (head h reads modality h % 3) with [simi | dissimi]
    packed along lanes, pads U up to a multiple of 128 (lane-dense stores), and
    optionally compresses the weights (bf16 or per-column-scaled int8).
    """
    assert weight_mode in ("float32", "bfloat16", "int8")
    gamma = params["gamma"].astype(jnp.float32)   # (6, D)
    beta = params["beta"].astype(jnp.float32)     # (6, D)
    w = params["w"].astype(jnp.float32)           # (6, D, U)
    b = params["b"].astype(jnp.float32)           # (6, U)
    U = int(w.shape[-1])
    Up = _round_up(U, 128)

    w_fold = gamma[:, :, None] * w                             # (6, D, U)
    b_fold = jnp.einsum("hd,hdu->hu", beta, w) + b             # (6, U)

    if Up != U:  # zero-pad lanes: padded columns produce tanh(0) = 0, sliced off later
        w_fold = jnp.pad(w_fold, ((0, 0), (0, 0), (0, Up - U)))
        b_fold = jnp.pad(b_fold, ((0, 0), (0, Up - U)))

    # Per-modality packs: modality m -> heads m (simi) and m+3 (dissimi).
    w_cat = jnp.concatenate([w_fold[:3], w_fold[3:]], axis=-1)  # (3, D, 2*Up)
    b_cat = jnp.concatenate([b_fold[:3], b_fold[3:]], axis=-1)  # (3, 2*Up)

    if weight_mode == "int8":
        absmax = jnp.max(jnp.abs(w_cat), axis=1, keepdims=True)        # (3, 1, 2*Up)
        scale = jnp.where(absmax > 0.0, absmax / 127.0, 1.0)
        w_out = jnp.round(w_cat / scale).astype(jnp.int8)
        scale_out = scale.astype(jnp.float32)
    else:
        dt = jnp.float32 if weight_mode == "float32" else jnp.bfloat16
        w_out = w_cat.astype(dt)
        scale_out = jnp.ones((3, 1, 2 * Up), jnp.float32)

    return {
        "w_cat": w_out,                                 # (3, D, 2*Up)
        "b_cat": b_cat[:, None, :].astype(jnp.float32),  # (3, 1, 2*Up)
        "scale": scale_out,                             # (3, 1, 2*Up)
        "uni_dim": U,
        "uni_dim_padded": Up,
    }


def tva_fusion_forward(x_t_embed, x_v_embed, x_a_embed, prepared,
                       out_dtype=jnp.float32):
    """Fusion portion of TVA_fusion.forward.

    Returns (x1_all (B, 6U), x1_sds (6B, U), common_feature (B, U)) exactly as the
    PyTorch forward builds them — all three produced by one pallas_call.
    """
    B, D = x_t_embed.shape
    U = prepared["uni_dim"]
    Up = prepared["uni_dim_padded"]
    w_cat, b_cat, scale = prepared["w_cat"], prepared["b_cat"], prepared["scale"]

    vmem = pl.BlockSpec(memory_space=pltpu.MemorySpace.VMEM)

    flops = 3 * 2 * B * D * (2 * Up)
    transcendentals = 3 * B * (2 * Up) + 3 * B          # tanh + rsqrt
    bytes_accessed = (
        w_cat.size * w_cat.dtype.itemsize
        + b_cat.size * b_cat.dtype.itemsize
        + scale.size * scale.dtype.itemsize
        + 3 * B * D * x_t_embed.dtype.itemsize
        + (B * 6 * Up + 6 * B * Up + B * Up) * jnp.dtype(out_dtype).itemsize)

    out_shapes = (
        jax.ShapeDtypeStruct((B, 6 * Up), out_dtype),    # x1_all (padded lanes)
        jax.ShapeDtypeStruct((6 * B, Up), out_dtype),    # x1_sds (padded lanes)
        jax.ShapeDtypeStruct((B, Up), out_dtype),        # common_feature
    )

    x1_all_p, x1_sds_p, common_p = pl.pallas_call(
        functools.partial(_tva_fusion_kernel, Up=Up, B=B),
        out_shape=out_shapes,
        in_specs=[vmem, vmem, vmem, vmem, vmem, vmem],
        out_specs=(vmem, vmem, vmem),
        cost_estimate=pl.CostEstimate(flops=flops,
                                      transcendentals=transcendentals,
                                      bytes_accessed=bytes_accessed),
    )(x_t_embed, x_v_embed, x_a_embed, w_cat, b_cat, scale)

    if Up == U:
        # Aligned path (U % 128 == 0): zero wrapper-side ops.
        return x1_all_p, x1_sds_p, common_p

    # Unaligned U fallback: strip the zero lane padding (rare; wrapper-side slices).
    x1_all = x1_all_p.reshape(B, 6, Up)[:, :, :U].reshape(B, 6 * U)
    return x1_all, x1_sds_p[:, :U], common_p[:, :U]


def init_params(key, encoder_fea_dim):
    """Deterministic parameter init for the six projection heads.

    gamma/beta are randomized (instead of the PyTorch default 1/0) purely so the
    LayerNorm-affine folding is numerically exercised in the correctness check.
    """
    D = encoder_fea_dim
    U = D // 2
    kw, kb, kg, kbeta = jax.random.split(key, 4)
    bound = 1.0 / jnp.sqrt(jnp.float32(D))
    return {
        "gamma": 1.0 + 0.1 * jax.random.normal(kg, (6, D), jnp.float32),
        "beta": 0.1 * jax.random.normal(kbeta, (6, D), jnp.float32),
        # Linear weight stored transposed for x @ W.
        "w": jax.random.uniform(kw, (6, D, U), jnp.float32, -bound, bound),
        "b": jax.random.uniform(kb, (6, U), jnp.float32, -bound, bound),
    }


def _reference(x_t, x_v, x_a, params):
    """Plain-JAX reference of the unfused PyTorch math (no folding)."""
    outs = []
    xs = [x_t, x_v, x_a, x_t, x_v, x_a]
    for h in range(6):
        x = xs[h]
        mean = jnp.mean(x, -1, keepdims=True)
        var = jnp.mean((x - mean) ** 2, -1, keepdims=True)
        xn = (x - mean) / jnp.sqrt(var + LN_EPS)
        xn = xn * params["gamma"][h] + params["beta"][h]
        outs.append(jnp.tanh(xn @ params["w"][h] + params["b"][h]))
    x1_all = jnp.concatenate(outs, axis=-1)
    x1_sds = jnp.concatenate(outs, axis=0)
    common = outs[0] + outs[1] + outs[2]
    return x1_all, x1_sds, common


def _check(got, ref, atol, rtol):
    for g, r in zip(got, ref):
        assert g.shape == r.shape, (g.shape, r.shape)
        assert jnp.allclose(g.astype(jnp.float32), r, atol=atol, rtol=rtol)


if __name__ == "__main__":
    B = 8               # batch
    D = 256             # encoder_fea_dim
    U = D // 2          # uni_fea_dim (= 128 -> lane-aligned fast path)

    key = jax.random.PRNGKey(0)
    k1, k2, k3, kp, k4, k5, k6, kp2 = jax.random.split(key, 8)

    # Stand-ins for the (external) text / vision / audio encoder outputs.
    x_t_embed = jax.random.normal(k1, (B, D), jnp.float32)
    x_v_embed = jax.random.normal(k2, (B, D), jnp.float32)
    x_a_embed = jax.random.normal(k3, (B, D), jnp.float32)

    params = init_params(kp, D)
    ref = _reference(x_t_embed, x_v_embed, x_a_embed, params)

    # 1) f32 weights: exact forward-pass semantics of the PyTorch module.
    prep_f32 = prepare_params(params, weight_mode="float32")
    out_f32 = jax.block_until_ready(
        tva_fusion_forward(x_t_embed, x_v_embed, x_a_embed, prep_f32))
    assert out_f32[0].shape == (B, 6 * U)
    assert out_f32[1].shape == (6 * B, U)
    assert out_f32[2].shape == (B, U)
    _check(out_f32, ref, atol=1e-5, rtol=1e-5)

    # 2) production default: bf16 weights (halves weight DMA; f32 MXU accumulate).
    prep_bf16 = prepare_params(params)  # weight_mode="bfloat16"
    out_bf16 = jax.block_until_ready(
        tva_fusion_forward(x_t_embed, x_v_embed, x_a_embed, prep_bf16))
    _check(out_bf16, ref, atol=3e-2, rtol=3e-2)

    # 3) int8 weights (v5e / v6e DMA saver; per-column scales, f32 elementwise path).
    prep_i8 = prepare_params(params, weight_mode="int8")
    out_i8 = jax.block_until_ready(
        tva_fusion_forward(x_t_embed, x_v_embed, x_a_embed, prep_i8))
    _check(out_i8, ref, atol=3e-2, rtol=3e-2)

    # 4) unaligned encoder_fea_dim (U % 128 != 0) -> padded-lane path, still exact.
    D2 = 192
    U2 = D2 // 2
    x_t2 = jax.random.normal(k4, (B, D2), jnp.float32)
    x_v2 = jax.random.normal(k5, (B, D2), jnp.float32)
    x_a2 = jax.random.normal(k6, (B, D2), jnp.float32)
    params2 = init_params(kp2, D2)
    ref2 = _reference(x_t2, x_v2, x_a2, params2)
    prep2 = prepare_params(params2, weight_mode="float32")
    out2 = jax.block_until_ready(tva_fusion_forward(x_t2, x_v2, x_a2, prep2))
    assert out2[0].shape == (B, 6 * U2)
    assert out2[1].shape == (6 * B, U2)
    assert out2[2].shape == (B, U2)
    _check(out2, ref2, atol=1e-5, rtol=1e-5)

    print("KERNEL_OK")
</pallas_src>

<mosaic_0001>
module attributes {stable_mosaic.version = 11 : i64} {
  func.func @_tva_fusion_kernel(%arg0: memref<8x256xf32, #tpu.memory_space<vmem>>, %arg1: memref<8x256xf32, #tpu.memory_space<vmem>>, %arg2: memref<8x256xf32, #tpu.memory_space<vmem>>, %arg3: memref<3x256x256xf32, #tpu.memory_space<vmem>>, %arg4: memref<3x1x256xf32, #tpu.memory_space<vmem>>, %arg5: memref<3x1x256xf32, #tpu.memory_space<vmem>>, %arg6: memref<8x768xf32, #tpu.memory_space<vmem>>, %arg7: memref<48x128xf32, #tpu.memory_space<vmem>>, %arg8: memref<8x128xf32, #tpu.memory_space<vmem>>) attributes {dimension_semantics = [], scalar_prefetch = 0 : i64, scratch_operands = 0 : i64, tpu.core_type = #tpu.core_type<tc>} {
    %c0 = arith.constant 0 : index
    %c0_0 = arith.constant 0 : index
    %0 = vector.load %arg0[%c0, %c0_0] : memref<8x256xf32, #tpu.memory_space<vmem>>, vector<8x256xf32>
    %cst = arith.constant dense<0.000000e+00> : vector<8xf32>
    %1 = vector.multi_reduction <add>, %0, %cst [1] : vector<8x256xf32> to vector<8xf32>
    %2 = vector.shape_cast %1 : vector<8xf32> to vector<8x1xf32>
    %cst_1 = arith.constant 2.560000e+02 : f32
    %3 = vector.broadcast %cst_1 : f32 to vector<8x1xf32>
    %4 = arith.divf %2, %3 : vector<8x1xf32>
    %5 = vector.broadcast %4 : vector<8x1xf32> to vector<8x256xf32>
    %6 = arith.subf %0, %5 : vector<8x256xf32>
    %7 = arith.mulf %6, %6 : vector<8x256xf32>
    %cst_2 = arith.constant dense<0.000000e+00> : vector<8xf32>
    %8 = vector.multi_reduction <add>, %7, %cst_2 [1] : vector<8x256xf32> to vector<8xf32>
    %9 = vector.shape_cast %8 : vector<8xf32> to vector<8x1xf32>
    %cst_3 = arith.constant 2.560000e+02 : f32
    %10 = vector.broadcast %cst_3 : f32 to vector<8x1xf32>
    %11 = arith.divf %9, %10 : vector<8x1xf32>
    %cst_4 = arith.constant 9.99999974E-6 : f32
    %12 = vector.broadcast %cst_4 : f32 to vector<8x1xf32>
    %13 = arith.addf %11, %12 : vector<8x1xf32>
    %14 = math.rsqrt %13 : vector<8x1xf32>
    %15 = vector.broadcast %14 : vector<8x1xf32> to vector<8x256xf32>
    %16 = arith.mulf %6, %15 : vector<8x256xf32>
    %c0_5 = arith.constant 0 : index
    %c0_6 = arith.constant 0 : index
    %c0_7 = arith.constant 0 : index
    %17 = vector.load %arg3[%c0_5, %c0_6, %c0_7] : memref<3x256x256xf32, #tpu.memory_space<vmem>>, vector<1x256x256xf32>
    %18 = vector.shape_cast %17 : vector<1x256x256xf32> to vector<256x256xf32>
    %cst_8 = arith.constant dense<0.000000e+00> : vector<8x256xf32>
    %19 = tpu.matmul %16, %18, %cst_8 {dimension_numbers = #tpu.dot_dimension_numbers<[1], [0], [0], [1], [0, 0, 1, 1], [], []>} : vector<8x256xf32>, vector<256x256xf32>, vector<8x256xf32> -> vector<8x256xf32>
    %c0_9 = arith.constant 0 : index
    %c0_10 = arith.constant 0 : index
    %c0_11 = arith.constant 0 : index
    %20 = vector.load %arg4[%c0_9, %c0_10, %c0_11] : memref<3x1x256xf32, #tpu.memory_space<vmem>>, vector<1x1x256xf32>
    %21 = vector.shape_cast %20 : vector<1x1x256xf32> to vector<1x256xf32>
    %22 = vector.broadcast %21 : vector<1x256xf32> to vector<8x256xf32>
    %23 = arith.addf %19, %22 : vector<8x256xf32>
    %24 = math.tanh %23 : vector<8x256xf32>
    %25 = vector.extract_strided_slice %24 {offsets = [0, 0], sizes = [8, 128], strides = [1, 1]} : vector<8x256xf32> to vector<8x128xf32>
    %26 = vector.extract_strided_slice %24 {offsets = [0, 128], sizes = [8, 128], strides = [1, 1]} : vector<8x256xf32> to vector<8x128xf32>
    %c0_12 = arith.constant 0 : index
    %c0_13 = arith.constant 0 : index
    %27 = vector.load %arg6[%c0_12, %c0_13] : memref<8x768xf32, #tpu.memory_space<vmem>>, vector<8x128xf32>
    tpu.vector_store %arg6[%c0_12, %c0_13], %25 {strides = array<i32>} : memref<8x768xf32, #tpu.memory_space<vmem>>, vector<8x128xf32>,
    %c0_14 = arith.constant 0 : index
    %c384 = arith.constant 384 : index
    %28 = vector.load %arg6[%c0_14, %c384] : memref<8x768xf32, #tpu.memory_space<vmem>>, vector<8x128xf32>
    tpu.vector_store %arg6[%c0_14, %c384], %26 {strides = array<i32>} : memref<8x768xf32, #tpu.memory_space<vmem>>, vector<8x128xf32>,
    %c0_15 = arith.constant 0 : index
    %c0_16 = arith.constant 0 : index
    %29 = vector.load %arg7[%c0_15, %c0_16] : memref<48x128xf32, #tpu.memory_space<vmem>>, vector<8x128xf32>
    tpu.vector_store %arg7[%c0_15, %c0_16], %25 {strides = array<i32>} : memref<48x128xf32, #tpu.memory_space<vmem>>, vector<8x128xf32>,
    %c24 = arith.constant 24 : index
    %c0_17 = arith.constant 0 : index
    %30 = vector.load %arg7[%c24, %c0_17] : memref<48x128xf32, #tpu.memory_space<vmem>>, vector<8x128xf32>
    tpu.vector_store %arg7[%c24, %c0_17], %26 {strides = array<i32>} : memref<48x128xf32, #tpu.memory_space<vmem>>, vector<8x128xf32>,
    %c0_18 = arith.constant 0 : index
    %c0_19 = arith.constant 0 : index
    %31 = vector.load %arg8[%c0_18, %c0_19] : memref<8x128xf32, #tpu.memory_space<vmem>>, vector<8x128xf32>
    tpu.vector_store %arg8[%c0_18, %c0_19], %25 {strides = array<i32>} : memref<8x128xf32, #tpu.memory_space<vmem>>, vector<8x128xf32>,
    %c0_20 = arith.constant 0 : index
    %c0_21 = arith.constant 0 : index
    %32 = vector.load %arg1[%c0_20, %c0_21] : memref<8x256xf32, #tpu.memory_space<vmem>>, vector<8x256xf32>
    %cst_22 = arith.constant dense<0.000000e+00> : vector<8xf32>
    %33 = vector.multi_reduction <add>, %32, %cst_22 [1] : vector<8x256xf32> to vector<8xf32>
    %34 = vector.shape_cast %33 : vector<8xf32> to vector<8x1xf32>
    %cst_23 = arith.constant 2.560000e+02 : f32
    %35 = vector.broadcast %cst_23 : f32 to vector<8x1xf32>
    %36 = arith.divf %34, %35 : vector<8x1xf32>
    %37 = vector.broadcast %36 : vector<8x1xf32> to vector<8x256xf32>
    %38 = arith.subf %32, %37 : vector<8x256xf32>
    %39 = arith.mulf %38, %38 : vector<8x256xf32>
    %cst_24 = arith.constant dense<0.000000e+00> : vector<8xf32>
    %40 = vector.multi_reduction <add>, %39, %cst_24 [1] : vector<8x256xf32> to vector<8xf32>
    %41 = vector.shape_cast %40 : vector<8xf32> to vector<8x1xf32>
    %cst_25 = arith.constant 2.560000e+02 : f32
    %42 = vector.broadcast %cst_25 : f32 to vector<8x1xf32>
    %43 = arith.divf %41, %42 : vector<8x1xf32>
    %cst_26 = arith.constant 9.99999974E-6 : f32
    %44 = vector.broadcast %cst_26 : f32 to vector<8x1xf32>
    %45 = arith.addf %43, %44 : vector<8x1xf32>
    %46 = math.rsqrt %45 : vector<8x1xf32>
    %47 = vector.broadcast %46 : vector<8x1xf32> to vector<8x256xf32>
    %48 = arith.mulf %38, %47 : vector<8x256xf32>
    %c1 = arith.constant 1 : index
    %c0_27 = arith.constant 0 : index
    %c0_28 = arith.constant 0 : index
    %49 = vector.load %arg3[%c1, %c0_27, %c0_28] : memref<3x256x256xf32, #tpu.memory_space<vmem>>, vector<1x256x256xf32>
    %50 = vector.shape_cast %49 : vector<1x256x256xf32> to vector<256x256xf32>
    %cst_29 = arith.constant dense<0.000000e+00> : vector<8x256xf32>
    %51 = tpu.matmul %48, %50, %cst_29 {dimension_numbers = #tpu.dot_dimension_numbers<[1], [0], [0], [1], [0, 0, 1, 1], [], []>} : vector<8x256xf32>, vector<256x256xf32>, vector<8x256xf32> -> vector<8x256xf32>
    %c1_30 = arith.constant 1 : index
    %c0_31 = arith.constant 0 : index
    %c0_32 = arith.constant 0 : index
    %52 = vector.load %arg4[%c1_30, %c0_31, %c0_32] : memref<3x1x256xf32, #tpu.memory_space<vmem>>, vector<1x1x256xf32>
    %53 = vector.shape_cast %52 : vector<1x1x256xf32> to vector<1x256xf32>
    %54 = vector.broadcast %53 : vector<1x256xf32> to vector<8x256xf32>
    %55 = arith.addf %51, %54 : vector<8x256xf32>
    %56 = math.tanh %55 : vector<8x256xf32>
    %57 = vector.extract_strided_slice %56 {offsets = [0, 0], sizes = [8, 128], strides = [1, 1]} : vector<8x256xf32> to vector<8x128xf32>
    %58 = vector.extract_strided_slice %56 {offsets = [0, 128], sizes = [8, 128], strides = [1, 1]} : vector<8x256xf32> to vector<8x128xf32>
    %c0_33 = arith.constant 0 : index
    %c128 = arith.constant 128 : index
    %59 = vector.load %arg6[%c0_33, %c128] : memref<8x768xf32, #tpu.memory_space<vmem>>, vector<8x128xf32>
    tpu.vector_store %arg6[%c0_33, %c128], %57 {strides = array<i32>} : memref<8x768xf32, #tpu.memory_space<vmem>>, vector<8x128xf32>,
    %c0_34 = arith.constant 0 : index
    %c512 = arith.constant 512 : index
    %60 = vector.load %arg6[%c0_34, %c512] : memref<8x768xf32, #tpu.memory_space<vmem>>, vector<8x128xf32>
    tpu.vector_store %arg6[%c0_34, %c512], %58 {strides = array<i32>} : memref<8x768xf32, #tpu.memory_space<vmem>>, vector<8x128xf32>,
    %c8 = arith.constant 8 : index
    %c0_35 = arith.constant 0 : index
    %61 = vector.load %arg7[%c8, %c0_35] : memref<48x128xf32, #tpu.memory_space<vmem>>, vector<8x128xf32>
    tpu.vector_store %arg7[%c8, %c0_35], %57 {strides = array<i32>} : memref<48x128xf32, #tpu.memory_space<vmem>>, vector<8x128xf32>,
    %c32 = arith.constant 32 : index
    %c0_36 = arith.constant 0 : index
    %62 = vector.load %arg7[%c32, %c0_36] : memref<48x128xf32, #tpu.memory_space<vmem>>, vector<8x128xf32>
    tpu.vector_store %arg7[%c32, %c0_36], %58 {strides = array<i32>} : memref<48x128xf32, #tpu.memory_space<vmem>>, vector<8x128xf32>,
    %c0_37 = arith.constant 0 : index
    %c0_38 = arith.constant 0 : index
    %63 = vector.load %arg8[%c0_37, %c0_38] : memref<8x128xf32, #tpu.memory_space<vmem>>, vector<8x128xf32>
    %64 = arith.addf %63, %57 : vector<8x128xf32>
    %c0_39 = arith.constant 0 : index
    %c0_40 = arith.constant 0 : index
    %65 = vector.load %arg8[%c0_39, %c0_40] : memref<8x128xf32, #tpu.memory_space<vmem>>, vector<8x128xf32>
    tpu.vector_store %arg8[%c0_39, %c0_40], %64 {strides = array<i32>} : memref<8x128xf32, #tpu.memory_space<vmem>>, vector<8x128xf32>,
    %c0_41 = arith.constant 0 : index
    %c0_42 = arith.constant 0 : index
    %66 = vector.load %arg2[%c0_41, %c0_42] : memref<8x256xf32, #tpu.memory_space<vmem>>, vector<8x256xf32>
    %cst_43 = arith.constant dense<0.000000e+00> : vector<8xf32>
    %67 = vector.multi_reduction <add>, %66, %cst_43 [1] : vector<8x256xf32> to vector<8xf32>
    %68 = vector.shape_cast %67 : vector<8xf32> to vector<8x1xf32>
    %cst_44 = arith.constant 2.560000e+02 : f32
    %69 = vector.broadcast %cst_44 : f32 to vector<8x1xf32>
    %70 = arith.divf %68, %69 : vector<8x1xf32>
    %71 = vector.broadcast %70 : vector<8x1xf32> to vector<8x256xf32>
    %72 = arith.subf %66, %71 : vector<8x256xf32>
    %73 = arith.mulf %72, %72 : vector<8x256xf32>
    %cst_45 = arith.constant dense<0.000000e+00> : vector<8xf32>
    %74 = vector.multi_reduction <add>, %73, %cst_45 [1] : vector<8x256xf32> to vector<8xf32>
    %75 = vector.shape_cast %74 : vector<8xf32> to vector<8x1xf32>
    %cst_46 = arith.constant 2.560000e+02 : f32
    %76 = vector.broadcast %cst_46 : f32 to vector<8x1xf32>
    %77 = arith.divf %75, %76 : vector<8x1xf32>
    %cst_47 = arith.constant 9.99999974E-6 : f32
    %78 = vector.broadcast %cst_47 : f32 to vector<8x1xf32>
    %79 = arith.addf %77, %78 : vector<8x1xf32>
    %80 = math.rsqrt %79 : vector<8x1xf32>
    %81 = vector.broadcast %80 : vector<8x1xf32> to vector<8x256xf32>
    %82 = arith.mulf %72, %81 : vector<8x256xf32>
    %c2 = arith.constant 2 : index
    %c0_48 = arith.constant 0 : index
    %c0_49 = arith.constant 0 : index
    %83 = vector.load %arg3[%c2, %c0_48, %c0_49] : memref<3x256x256xf32, #tpu.memory_space<vmem>>, vector<1x256x256xf32>
    %84 = vector.shape_cast %83 : vector<1x256x256xf32> to vector<256x256xf32>
    %cst_50 = arith.constant dense<0.000000e+00> : vector<8x256xf32>
    %85 = tpu.matmul %82, %84, %cst_50 {dimension_numbers = #tpu.dot_dimension_numbers<[1], [0], [0], [1], [0, 0, 1, 1], [], []>} : vector<8x256xf32>, vector<256x256xf32>, vector<8x256xf32> -> vector<8x256xf32>
    %c2_51 = arith.constant 2 : index
    %c0_52 = arith.constant 0 : index
    %c0_53 = arith.constant 0 : index
    %86 = vector.load %arg4[%c2_51, %c0_52, %c0_53] : memref<3x1x256xf32, #tpu.memory_space<vmem>>, vector<1x1x256xf32>
    %87 = vector.shape_cast %86 : vector<1x1x256xf32> to vector<1x256xf32>
    %88 = vector.broadcast %87 : vector<1x256xf32> to vector<8x256xf32>
    %89 = arith.addf %85, %88 : vector<8x256xf32>
    %90 = math.tanh %89 : vector<8x256xf32>
    %91 = vector.extract_strided_slice %90 {offsets = [0, 0], sizes = [8, 128], strides = [1, 1]} : vector<8x256xf32> to vector<8x128xf32>
    %92 = vector.extract_strided_slice %90 {offsets = [0, 128], sizes = [8, 128], strides = [1, 1]} : vector<8x256xf32> to vector<8x128xf32>
    %c0_54 = arith.constant 0 : index
    %c256 = arith.constant 256 : index
    %93 = vector.load %arg6[%c0_54, %c256] : memref<8x768xf32, #tpu.memory_space<vmem>>, vector<8x128xf32>
    tpu.vector_store %arg6[%c0_54, %c256], %91 {strides = array<i32>} : memref<8x768xf32, #tpu.memory_space<vmem>>, vector<8x128xf32>,
    %c0_55 = arith.constant 0 : index
    %c640 = arith.constant 640 : index
    %94 = vector.load %arg6[%c0_55, %c640] : memref<8x768xf32, #tpu.memory_space<vmem>>, vector<8x128xf32>
    tpu.vector_store %arg6[%c0_55, %c640], %92 {strides = array<i32>} : memref<8x768xf32, #tpu.memory_space<vmem>>, vector<8x128xf32>,
    %c16 = arith.constant 16 : index
    %c0_56 = arith.constant 0 : index
    %95 = vector.load %arg7[%c16, %c0_56] : memref<48x128xf32, #tpu.memory_space<vmem>>, vector<8x128xf32>
    tpu.vector_store %arg7[%c16, %c0_56], %91 {strides = array<i32>} : memref<48x128xf32, #tpu.memory_space<vmem>>, vector<8x128xf32>,
    %c40 = arith.constant 40 : index
    %c0_57 = arith.constant 0 : index
    %96 = vector.load %arg7[%c40, %c0_57] : memref<48x128xf32, #tpu.memory_space<vmem>>, vector<8x128xf32>
    tpu.vector_store %arg7[%c40, %c0_57], %92 {strides = array<i32>} : memref<48x128xf32, #tpu.memory_space<vmem>>, vector<8x128xf32>,
    %c0_58 = arith.constant 0 : index
    %c0_59 = arith.constant 0 : index
    %97 = vector.load %arg8[%c0_58, %c0_59] : memref<8x128xf32, #tpu.memory_space<vmem>>, vector<8x128xf32>
    %98 = arith.addf %97, %91 : vector<8x128xf32>
    %c0_60 = arith.constant 0 : index
    %c0_61 = arith.constant 0 : index
    %99 = vector.load %arg8[%c0_60, %c0_61] : memref<8x128xf32, #tpu.memory_space<vmem>>, vector<8x128xf32>
    tpu.vector_store %arg8[%c0_60, %c0_61], %98 {strides = array<i32>} : memref<8x128xf32, #tpu.memory_space<vmem>>, vector<8x128xf32>,
    return
  }
}

</mosaic_0001>

<bundles_post_ra>
// kernel: tpu_custom_call.1
= control target key start
LH: loop header
LB: loop body
LE: loop exit
PB: predicated region body
PF: predicated region fallthrough
CT: control target
= control target key end

     0   :  { %14 = vsyncpa [#allocation3], 0  ;;  %s1176_s0 = inlined_call_operand.hbm [shape: f32[8,256], index: 0, kind: input, shape index: {}]   ;;  %s1177_s1 = inlined_call_operand.hbm [shape: f32[8,256], index: 1, kind: input, shape index: {}]   ;;  %s1178_s2 = inlined_call_operand.hbm [shape: f32[8,256], index: 2, kind: input, shape index: {}]   ;;  %s1179_s3 = inlined_call_operand.hbm [shape: f32[3,256,256], index: 3, kind: input, shape index: {}]   ;;  %s1180_s4 = inlined_call_operand.hbm [shape: f32[3,1,256], index: 4, kind: input, shape index: {}]   ;;  %s1181_s5 = inlined_call_operand.hbm [shape: f32[3,1,256], index: 5, kind: input, shape index: {}]   ;;  %s1182_s6 = inlined_call_operand.hbm [shape: f32[8,768], index: 6, kind: output, shape index: {0}]   ;;  %s1183_s7 = inlined_call_operand.hbm [shape: f32[48,128], index: 7, kind: output, shape index: {1}]   ;;  %s1184_s8 = inlined_call_operand.hbm [shape: f32[8,128], index: 8, kind: output, shape index: {2}]  }
   0x1   :  { %15 = vsyncpa [#allocation6], 0 }
   0x2   :  { %16 = vsyncpa [#allocation9], 0 }
   0x3   :  { %17 = vsyncpa [#allocation12], 0 }
   0x4   :  { %18 = vsyncpa [#allocation4], 0  ;;  %s36_s29 = sshll.u32 %s1177_s1, 4  ;;  %s37_s29 = int_to_ptr.hbm [resolvable:$true] %s36_s29 }
   0x5   :  { %19 = vsyncpa [#allocation15], 0  ;;  %s1000_s30 = smov [#allocation5]   ;;  %s57_s12 = sshll.u32 %s1179_s3, 4  ;;  %s58_s12 = int_to_ptr.hbm [resolvable:$true] %s57_s12 }
   0x6   :  { %s38_s9 = sshll.u32 %s1000_s30, 4  ;;  %s1001_s13 = smov [#allocation8]   ;;  %s39_s9 = int_to_ptr.vmem [resolvable:$true] %s38_s9 }
   0x7   :  { %41 = dma.hbm_to_vmem [thread:$0]  %s37_s29, 256, %s39_s9, [#allocation6]  }
   0x8   :  { %s59_s14 = sshll.u32 %s1001_s13, 4  ;;  %s1002_s15 = smov 256   ;;  %s60_s14 = int_to_ptr.vmem [resolvable:$true] %s59_s14 }
   0x9   :  { %s1003_s16 = smov 16   ;;  %s25_s1 = sshll.u32 %s1176_s0, 4  ;;  %s26_s1 = int_to_ptr.hbm [resolvable:$true] %s25_s1 }
   0xa   :  { %65 = dma.hbm_to_vmem [thread:$0]  %s58_s12, 24576, %s60_s14, [#allocation9], %s1002_s15, %s1002_s15, %s1003_s16  }
   0xb   :  { %s1004_s19 = smov [#allocation2]   ;;  %s47_s3 = sshll.u32 %s1178_s2, 4  ;;  %s48_s3 = int_to_ptr.hbm [resolvable:$true] %s47_s3 }
   0xc   :  { %s27_s20 = sshll.u32 %s1004_s19, 4  ;;  %s1005_s23 = smov [#allocation7]   ;;  %s28_s20 = int_to_ptr.vmem [resolvable:$true] %s27_s20 }
   0xd   :  { %30 = dma.hbm_to_vmem [thread:$0]  %s26_s1, 256, %s28_s20, [#allocation3]  }
   0xe   :  { %s49_s24 = sshll.u32 %s1005_s23, 4  ;;  %s70_s27 = sshll.u32 %s1180_s4, 4  ;;  %s50_s24 = int_to_ptr.vmem [resolvable:$true] %s49_s24  ;;  %s71_s27 = int_to_ptr.hbm [resolvable:$true] %s70_s27 }
   0xf   :  { %52 = dma.hbm_to_vmem [thread:$0]  %s48_s3, 256, %s50_s24, [#allocation6]  }
  0x10   :  { %s1006_s0 = smov [#allocation10]   ;;  %s83_s9 = sshll.u32 %s1181_s5, 4  ;;  %s84_s9 = int_to_ptr.hbm [resolvable:$true] %s83_s9 }
  0x11   :  { %s72_s28 = sshll.u32 %s1006_s0, 4  ;;  %s1007_s10 = smov 32   ;;  %s73_s28 = int_to_ptr.vmem [resolvable:$true] %s72_s28 }
  0x12   :  { %s1008_s2 = smov 2   ;;  %s1009_s11 = smov [#allocation11]  }
  0x13   :  { %78 = dma.hbm_to_vmem [thread:$0]  %s71_s27, 96, %s73_s28, [#allocation9], %s1007_s10, %s1007_s10, %s1008_s2  }
  0x14   :  { %s85_s12 = sshll.u32 %s1009_s11, 4  ;;  %s86_s12 = int_to_ptr.vmem [resolvable:$true] %s85_s12 }
  0x15   :  { %91 = dma.hbm_to_vmem [thread:$0]  %s84_s9, 96, %s86_s12, [#allocation12], %s1007_s10, %s1007_s10, %s1008_s2  }
  0x16   :  { %988 = dma.done.wait [#allocation3], 256  }
  0x17   :  { %989 = vsyncadd [#allocation3], 4294967040 }
  0x18   :  { %990 = dma.done.wait [#allocation6], 512  }
  0x19   :  { %991 = vsyncadd [#allocation6], 4294966784 }
  0x1a   :  { %992 = dma.done.wait [#allocation9], 24672  }
  0x1b   :  { %993 = vsyncadd [#allocation9], 4294942624 }
  0x1c   :  { %994 = dma.done.wait [#allocation12], 96  }
  0x1d   :  { %995 = vsyncadd [#allocation12], 4294967200  ;;  %v1079_v0 = vld [vmem:[#allocation2] sm:$0xff]  ;;  %v1081_v1 = vld [vmem:[#allocation2 + $0x8] sm:$0xff]  ;;  %v1010_v9 = vmov 256.0   ;;  %s1011_s4 = smov [#allocation14]  }
  0x1e   :  { %v118_v2 = vadd.f32 %v1081_v1, %v1079_v0  ;;  %v1085_v3 = vld [vmem:[#allocation7] sm:$0xff]  ;;  %v1087_v4 = vld [vmem:[#allocation7 + $0x8] sm:$0xff]  ;;  %v1091_v6 = vld [vmem:[#allocation5] sm:$0xff]  ;;  %752 = vrcp.f32 %v1010_v9  ;;  %s698_s5 = sshll.u32 %s1011_s4, 4  ;;  %s700_s15 = sshll.u32 %s1183_s7, 4  ;;  %s699_s5 = int_to_ptr.vmem [resolvable:$true] %s698_s5  ;;  %s701_s15 = int_to_ptr.hbm [resolvable:$true] %s700_s15 }
  0x1f   :  { %v497_v5 = vadd.f32 %v1087_v4, %v1085_v3  ;;  %v1093_v7 = vld [vmem:[#allocation5 + $0x8] sm:$0xff]  ;;  %v180_v14 = vld [vmem:[#allocation8 + $0xf0] sm:$0xff]  ;;  %v181_v16 = vld [vmem:[#allocation8 + $0xf8] sm:$0xff]  ;;  %s1012_s16 = smov [#allocation13]   ;;  %s690_s19 = sshll.u32 %s1182_s6, 4  ;;  %s691_s19 = int_to_ptr.hbm [resolvable:$true] %s690_s19 }
  0x20   :  { %119 = vadd.xlane.f32.xlu0 %v118_v2  ;;  %v309_v8 = vadd.f32 %v1093_v7, %v1091_v6  ;;  %v212_v15 = vld [vmem:[#allocation8 + $0x1f0] sm:$0xff]  ;;  %220 = vmatpush.msra.mxu0 %v180_v14  ;;  %v213_v18 = vld [vmem:[#allocation8 + $0x1f8] sm:$0xff]  ;;  %v178_v19 = vld [vmem:[#allocation8 + $0xe0] sm:$0xff]  ;;  %s688_s17 = sshll.u32 %s1012_s16, 4  ;;  %s1013_s20 = smov [#allocation16]   ;;  %s689_s17 = int_to_ptr.vmem [resolvable:$true] %s688_s17 }
  0x21   :  { %498 = vadd.xlane.f32.xlu1 %v497_v5  ;;  %240 = vmatpush.msra.mxu1 %v212_v15  ;;  %v210_v20 = vld [vmem:[#allocation8 + $0x1e0] sm:$0xff]  ;;  %v179_v21 = vld [vmem:[#allocation8 + $0xe8] sm:$0xff]  ;;  %v176_v23 = vld [vmem:[#allocation8 + $0xd0] sm:$0xff]  ;;  %s712_s21 = sshll.u32 %s1013_s20, 4  ;;  %s714_s23 = sshll.u32 %s1184_s8, 4  ;;  %s713_s21 = int_to_ptr.vmem [resolvable:$true] %s712_s21  ;;  %s715_s23 = int_to_ptr.hbm [resolvable:$true] %s714_s23 }
  0x22   :  { %260 = vmatpush.msra.mxu2 %v181_v16  ;;  %280 = vmatpush.msra.mxu3 %v213_v18  ;;  %v211_v22 = vld [vmem:[#allocation8 + $0x1e8] sm:$0xff]  ;;  %v208_v24 = vld [vmem:[#allocation8 + $0x1d0] sm:$0xff]  ;;  %v177_v25 = vld [vmem:[#allocation8 + $0xd8] sm:$0xff]  ;;  %s1014_s7 = smov 128   ;;  %s1015_s24 = smov 8  }
  0x23   :  { %221 = vmatpush.msra.mxu0 %v178_v19  ;;  %241 = vmatpush.msra.mxu1 %v210_v20  ;;  %v209_v26 = vld [vmem:[#allocation8 + $0x1d8] sm:$0xff]  ;;  %v174_v27 = vld [vmem:[#allocation8 + $0xc0] sm:$0xff]  ;;  %v175_v30 = vld [vmem:[#allocation8 + $0xc8] sm:$0xff] }
  0x24   :  { %v753_v10 = vpop.eup %752  ;;  %261 = vmatpush.msra.mxu2 %v179_v21  ;;  %281 = vmatpush.msra.mxu3 %v211_v22  ;;  %v206_v28 = vld [vmem:[#allocation8 + $0x1c0] sm:$0xff]  ;;  %v207_v31 = vld [vmem:[#allocation8 + $0x1c8] sm:$0xff]  ;;  %v172_v32 = vld [vmem:[#allocation8 + $0xb0] sm:$0xff] }
  0x25   :  { %v122_v11 = vmul.f32 256.0, %v753_v10  ;;  %vm126_vm0 = vweird.f32 %v753_v10  ;;  %222 = vmatpush.msra.mxu0 %v176_v23  ;;  %242 = vmatpush.msra.mxu1 %v208_v24  ;;  %v204_v33 = vld [vmem:[#allocation8 + $0x1b0] sm:$0xff]  ;;  %v173_v35 = vld [vmem:[#allocation8 + $0xb8] sm:$0xff]  ;;  %v170_v38 = vld [vmem:[#allocation8 + $0xa0] sm:$0xff] }
  0x26   :  { %262 = vmatpush.msra.mxu2 %v177_v25  ;;  %282 = vmatpush.msra.mxu3 %v209_v26  ;;  %v205_v36 = vld [vmem:[#allocation8 + $0x1b8] sm:$0xff]  ;;  %v202_v39 = vld [vmem:[#allocation8 + $0x1a0] sm:$0xff]  ;;  %v171_v40 = vld [vmem:[#allocation8 + $0xa8] sm:$0xff] }
  0x27   :  { %v123_v12 = vsub.f32 1.0, %v122_v11  ;;  %223 = vmatpush.msra.mxu0 %v174_v27  ;;  %243 = vmatpush.msra.mxu1 %v206_v28  ;;  %v203_v41 = vld [vmem:[#allocation8 + $0x1a8] sm:$0xff]  ;;  %v168_v44 = vld [vmem:[#allocation8 + $0x90] sm:$0xff]  ;;  %v169_v46 = vld [vmem:[#allocation8 + $0x98] sm:$0xff] }
  0x28   :  { %310 = vadd.xlane.f32.xlu0 %v309_v8  ;;  %263 = vmatpush.msra.mxu2 %v175_v30  ;;  %v200_v45 = vld [vmem:[#allocation8 + $0x190] sm:$0xff]  ;;  %v201_v47 = vld [vmem:[#allocation8 + $0x198] sm:$0xff]  ;;  %v166_v51 = vld [vmem:[#allocation8 + $0x80] sm:$0xff] }
  0x29   :  { %v124_v13 = vmul.f32 %v753_v10, %v123_v12  ;;  %283 = vmatpush.msra.mxu3 %v207_v31  ;;  %224 = vmatpush.msra.mxu0 %v172_v32  ;;  %v198_v52 = vld [vmem:[#allocation8 + $0x180] sm:$0xff]  ;;  %v167_v53 = vld [vmem:[#allocation8 + $0x88] sm:$0xff]  ;;  %v164_v56 = vld [vmem:[#allocation8 + $0x70] sm:$0xff] }
  0x2a   :  { %244 = vmatpush.msra.mxu1 %v204_v33  ;;  %264 = vmatpush.msra.mxu2 %v173_v35  ;;  %v199_v55 = vld [vmem:[#allocation8 + $0x188] sm:$0xff]  ;;  %v196_v59 = vld [vmem:[#allocation8 + $0x170] sm:$0xff]  ;;  %v165_v60 = vld [vmem:[#allocation8 + $0x78] sm:$0xff] }
  0x2b   :  { %v125_v17 = vadd.f32 %v753_v10, %v124_v13  ;;  %284 = vmatpush.msra.mxu3 %v205_v36  ;;  %225 = vmatpush.msra.mxu0 %v170_v38  ;;  %v197_v62 = vld [vmem:[#allocation8 + $0x178] sm:$0xff]  ;;  %v162_v63 = vld [vmem:[#allocation8 + $0x60] sm:$0xff]  ;;  %v195_v8 = vld [vmem:[#allocation8 + $0x168] sm:$0xff] }
  0x2c   :  { %245 = vmatpush.msra.mxu1 %v202_v39  ;;  %265 = vmatpush.msra.mxu2 %v171_v40  ;;  %v160_v9 = vld [vmem:[#allocation8 + $0x50] sm:$0xff]  ;;  %v161_v12 = vld [vmem:[#allocation8 + $0x58] sm:$0xff]  ;;  %v158_v15 = vld [vmem:[#allocation8 + $0x40] sm:$0xff] }
  0x2d   :  { %v1097_v29 = vsel %vm126_vm0, %v753_v10, %v125_v17  ;;  %285 = vmatpush.msra.mxu3 %v203_v41  ;;  %226 = vmatpush.msra.mxu0 %v168_v44  ;;  %v192_v11 = vld [vmem:[#allocation8 + $0x150] sm:$0xff]  ;;  %v193_v14 = vld [vmem:[#allocation8 + $0x158] sm:$0xff]  ;;  %v159_v17 = vld [vmem:[#allocation8 + $0x48] sm:$0xff] }
  0x2e   :  { %246 = vmatpush.msra.mxu1 %v200_v45  ;;  %266 = vmatpush.msra.mxu2 %v169_v46  ;;  %v191_v18 = vld [vmem:[#allocation8 + $0x148] sm:$0xff]  ;;  %v188_v19 = vld [vmem:[#allocation8 + $0x130] sm:$0xff]  ;;  %v157_v22 = vld [vmem:[#allocation8 + $0x38] sm:$0xff] }
  0x2f   :  { %286 = vmatpush.msra.mxu3 %v201_v47  ;;  %227 = vmatpush.msra.mxu0 %v166_v51  ;;  %v189_v23 = vld [vmem:[#allocation8 + $0x138] sm:$0xff]  ;;  %v154_v24 = vld [vmem:[#allocation8 + $0x20] sm:$0xff]  ;;  %v155_v26 = vld [vmem:[#allocation8 + $0x28] sm:$0xff] }
  0x30   :  { %247 = vmatpush.msra.mxu1 %v198_v52  ;;  %267 = vmatpush.msra.mxu2 %v167_v53  ;;  %v186_v25 = vld [vmem:[#allocation8 + $0x120] sm:$0xff]  ;;  %v187_v27 = vld [vmem:[#allocation8 + $0x128] sm:$0xff]  ;;  %v152_v28 = vld [vmem:[#allocation8 + $0x10] sm:$0xff] }
  0x31   :  { %287 = vmatpush.msra.mxu3 %v199_v55  ;;  %228 = vmatpush.msra.mxu0 %v164_v56  ;;  %v184_v30 = vld [vmem:[#allocation8 + $0x110] sm:$0xff]  ;;  %v153_v32 = vld [vmem:[#allocation8 + $0x18] sm:$0xff]  ;;  %v182_v35 = vld [vmem:[#allocation8 + $0x100] sm:$0xff] }
  0x32   :  { %248 = vmatpush.msra.mxu1 %v196_v59  ;;  %268 = vmatpush.msra.mxu2 %v165_v60  ;;  %v185_v33 = vld [vmem:[#allocation8 + $0x118] sm:$0xff]  ;;  %v151_v36 = vld [vmem:[#allocation8 + $0x8] sm:$0xff]  ;;  %v365_v38 = vld [vmem:[#allocation8 + $0x2f0] sm:$0xff] }
  0x33   :  { %288 = vmatpush.msra.mxu3 %v197_v62  ;;  %229 = vmatpush.msra.mxu0 %v162_v63  ;;  %v397_v39 = vld [vmem:[#allocation8 + $0x3f0] sm:$0xff]  ;;  %v366_v40 = vld [vmem:[#allocation8 + $0x2f8] sm:$0xff]  ;;  %v363_v44 = vld [vmem:[#allocation8 + $0x2e0] sm:$0xff] }
  0x34   :  { %v398_v41 = vld [vmem:[#allocation8 + $0x3f8] sm:$0xff]  ;;  %v395_v45 = vld [vmem:[#allocation8 + $0x3e0] sm:$0xff]  ;;  %v364_v46 = vld [vmem:[#allocation8 + $0x2e8] sm:$0xff] }
  0x35   :  { %289 = vmatpush.msra.mxu3 %v195_v8  ;;  %230 = vmatpush.msra.mxu0 %v160_v9  ;;  %v396_v47 = vld [vmem:[#allocation8 + $0x3e8] sm:$0xff]  ;;  %v394_v51 = vld [vmem:[#allocation8 + $0x3d8] sm:$0xff]  ;;  %v359_v52 = vld [vmem:[#allocation8 + $0x2c0] sm:$0xff] }
  0x36   :  { %v391_v53 = vld [vmem:[#allocation8 + $0x3c0] sm:$0xff]  ;;  %v392_v55 = vld [vmem:[#allocation8 + $0x3c8] sm:$0xff]  ;;  %v357_v56 = vld [vmem:[#allocation8 + $0x2b0] sm:$0xff] }
  0x37   :  { %290 = vmatpush.msra.mxu3 %v193_v14  ;;  %231 = vmatpush.msra.mxu0 %v158_v15  ;;  %v390_v59 = vld [vmem:[#allocation8 + $0x3b8] sm:$0xff]  ;;  %v355_v60 = vld [vmem:[#allocation8 + $0x2a0] sm:$0xff]  ;;  %v356_v62 = vld [vmem:[#allocation8 + $0x2a8] sm:$0xff] }
  0x38   :  { %v388_v63 = vld [vmem:[#allocation8 + $0x3a8] sm:$0xff]  ;;  %v354_v8 = vld [vmem:[#allocation8 + $0x298] sm:$0xff]  ;;  %v349_v14 = vld [vmem:[#allocation8 + $0x270] sm:$0xff] }
  0x39   :  { %291 = vmatpush.msra.mxu3 %v191_v18  ;;  %v386_v9 = vld [vmem:[#allocation8 + $0x398] sm:$0xff]  ;;  %v381_v15 = vld [vmem:[#allocation8 + $0x370] sm:$0xff]  ;;  %v379_v18 = vld [vmem:[#allocation8 + $0x360] sm:$0xff] }
  0x3b   :  { %292 = vmatpush.msra.mxu3 %v189_v23  ;;  %v378_v23 = vld [vmem:[#allocation8 + $0x358] sm:$0xff] }
  0x3d   :  { %293 = vmatpush.msra.mxu3 %v187_v27  ;;  %v376_v27 = vld [vmem:[#allocation8 + $0x348] sm:$0xff] }
  0x3f   :  { %294 = vmatpush.msra.mxu3 %v185_v33  ;;  %v339_v33 = vld [vmem:[#allocation8 + $0x220] sm:$0xff] }
  0x93   :  { %v120_v34 = vpop.xlane.xlu0 %119 }
  0x94   :  { %v128_v37 = vmul.f32 %v1097_v29, %v120_v34  ;;  %v499_v50 = vpop.xlane.xlu1 %498  ;;  %v150_v34 = vld [vmem:[#allocation8] sm:$0xff] }
  0x95   :  { %v500_v58 = vmul.f32 %v499_v50, %v1097_v29  ;;  %v362_v50 = vld [vmem:[#allocation8 + $0x2d8] sm:$0xff] }
  0x96   :  { %v1101_v42 = vsub.f32 %v1079_v0, %v128_v37  ;;  %v1104_v43 = vsub.f32 %v1081_v1, %v128_v37  ;;  %v194_v0 = vld [vmem:[#allocation8 + $0x160] sm:$0xff]  ;;  %v163_v1 = vld [vmem:[#allocation8 + $0x68] sm:$0xff] }
  0x97   :  { %v1119_v10 = vsub.f32 %v1085_v3, %v500_v58  ;;  %v1122_v13 = vsub.f32 %v1087_v4, %v500_v58  ;;  %249 = vmatpush.msra.mxu1 %v194_v0  ;;  %269 = vmatpush.msra.mxu2 %v163_v1  ;;  %v190_v3 = vld [vmem:[#allocation8 + $0x140] sm:$0xff]  ;;  %v156_v4 = vld [vmem:[#allocation8 + $0x30] sm:$0xff]  ;;  %v183_v37 = vld [vmem:[#allocation8 + $0x108] sm:$0xff] }
  0x98   :  { %v131_v48 = vmul.f32 %v1101_v42, %v1101_v42  ;;  %v132_v49 = vmul.f32 %v1104_v43, %v1104_v43  ;;  %232 = vmatpush.msra.mxu0 %v156_v4  ;;  %295 = vmatpush.msra.mxu3 %v183_v37  ;;  %v358_v58 = vld [vmem:[#allocation8 + $0x2b8] sm:$0xff]  ;;  %v353_v0 = vld [vmem:[#allocation8 + $0x290] sm:$0xff]  ;;  %v348_v4 = vld [vmem:[#allocation8 + $0x268] sm:$0xff] }
  0x99   :  { %250 = vmatpush.msra.mxu1 %v192_v11  ;;  %270 = vmatpush.msra.mxu2 %v161_v12  ;;  %v503_v20 = vmul.f32 %v1119_v10, %v1119_v10  ;;  %v504_v21 = vmul.f32 %v1122_v13, %v1122_v13  ;;  %v385_v1 = vld [vmem:[#allocation8 + $0x390] sm:$0xff]  ;;  %v351_v11 = vld [vmem:[#allocation8 + $0x280] sm:$0xff] }
  0x9a   :  { %v133_v54 = vadd.f32 %v132_v49, %v131_v48  ;;  %233 = vmatpush.msra.mxu0 %v154_v24  ;;  %v361_v48 = vld [vmem:[#allocation8 + $0x2d0] sm:$0xff]  ;;  %466 = vmatpush.msrb.mxu3 %v398_v41  ;;  %v383_v12 = vld [vmem:[#allocation8 + $0x380] sm:$0xff] }
  0x9b   :  { %v311_v57 = vpop.xlane.xlu0 %310  ;;  %251 = vmatpush.msra.mxu1 %v190_v3  ;;  %271 = vmatpush.msra.mxu2 %v159_v17  ;;  %v505_v31 = vadd.f32 %v504_v21, %v503_v20  ;;  %v393_v49 = vld [vmem:[#allocation8 + $0x3d0] sm:$0xff]  ;;  %v350_v3 = vld [vmem:[#allocation8 + $0x278] sm:$0xff]  ;;  %v347_v17 = vld [vmem:[#allocation8 + $0x260] sm:$0xff] }
  0x9c   :  { %v312_v61 = vmul.f32 %v311_v57, %v1097_v29  ;;  %134 = vadd.xlane.f32.xlu1 %v133_v54  ;;  %234 = vmatpush.msra.mxu0 %v152_v28  ;;  %v360_v54 = vld [vmem:[#allocation8 + $0x2c8] sm:$0xff]  ;;  %v389_v57 = vld [vmem:[#allocation8 + $0x3b0] sm:$0xff]  ;;  %v343_v24 = vld [vmem:[#allocation8 + $0x240] sm:$0xff] }
  0x9d   :  { %252 = vmatpush.msra.mxu1 %v188_v19  ;;  %272 = vmatpush.msra.mxu2 %v157_v22  ;;  %v380_v19 = vld [vmem:[#allocation8 + $0x368] sm:$0xff]  ;;  %v345_v20 = vld [vmem:[#allocation8 + $0x250] sm:$0xff]  ;;  %v346_v22 = vld [vmem:[#allocation8 + $0x258] sm:$0xff] }
  0x9e   :  { %v1113_v2 = vsub.f32 %v1091_v6, %v312_v61  ;;  %v1116_v5 = vsub.f32 %v1093_v7, %v312_v61  ;;  %235 = vmatpush.msra.mxu0 %v150_v34  ;;  %467 = vmatpush.msrb.mxu3 %v396_v47  ;;  %v387_v61 = vld [vmem:[#allocation8 + $0x3a0] sm:$0xff]  ;;  %v377_v21 = vld [vmem:[#allocation8 + $0x350] sm:$0xff] }
  0x9f   :  { %253 = vmatpush.msra.mxu1 %v186_v25  ;;  %273 = vmatpush.msra.mxu2 %v155_v26  ;;  %v375_v25 = vld [vmem:[#allocation8 + $0x340] sm:$0xff]  ;;  %v344_v26 = vld [vmem:[#allocation8 + $0x248] sm:$0xff]  ;;  %v341_v28 = vld [vmem:[#allocation8 + $0x230] sm:$0xff] }
  0xa0   :  { %v315_v6 = vmul.f32 %v1113_v2, %v1113_v2  ;;  %v316_v7 = vmul.f32 %v1116_v5, %v1116_v5  ;;  %406 = vmatpush.msrb.mxu0 %v365_v38  ;;  %468 = vmatpush.msrb.mxu3 %v394_v51  ;;  %v371_v34 = vld [vmem:[#allocation8 + $0x320] sm:$0xff]  ;;  %v337_v37 = vld [vmem:[#allocation8 + $0x210] sm:$0xff] }
  0xa1   :  { %254 = vmatpush.msra.mxu1 %v184_v30  ;;  %274 = vmatpush.msra.mxu2 %v153_v32  ;;  %v373_v30 = vld [vmem:[#allocation8 + $0x330] sm:$0xff]  ;;  %v374_v32 = vld [vmem:[#allocation8 + $0x338] sm:$0xff]  ;;  %v335_v41 = vld [vmem:[#allocation8 + $0x200] sm:$0xff] }
  0xa2   :  { %v317_v16 = vadd.f32 %v316_v7, %v315_v6  ;;  %407 = vmatpush.msrb.mxu0 %v363_v44  ;;  %469 = vmatpush.msrb.mxu3 %v392_v55  ;;  %v352_v6 = vld [vmem:[#allocation8 + $0x288] sm:$0xff]  ;;  %v369_v38 = vld [vmem:[#allocation8 + $0x310] sm:$0xff]  ;;  %v367_v44 = vld [vmem:[#allocation8 + $0x300] sm:$0xff] }
  0xa3   :  { %255 = vmatpush.msra.mxu1 %v182_v35  ;;  %275 = vmatpush.msra.mxu2 %v151_v36  ;;  %v384_v7 = vld [vmem:[#allocation8 + $0x388] sm:$0xff] }
  0xa4   :  { %318 = vadd.xlane.f32.xlu2 %v317_v16  ;;  %408 = vmatpush.msrb.mxu0 %v361_v48  ;;  %v382_v16 = vld [vmem:[#allocation8 + $0x378] sm:$0xff]  ;;  %v340_v35 = vld [vmem:[#allocation8 + $0x228] sm:$0xff] }
  0xa5   :  { %426 = vmatpush.msrb.mxu1 %v397_v39  ;;  %446 = vmatpush.msrb.mxu2 %v366_v40  ;;  %v372_v36 = vld [vmem:[#allocation8 + $0x328] sm:$0xff]  ;;  %v338_v39 = vld [vmem:[#allocation8 + $0x218] sm:$0xff] }
  0xa6   :  { %409 = vmatpush.msrb.mxu0 %v359_v52  ;;  %470 = vmatpush.msrb.mxu3 %v390_v59  ;;  %v370_v40 = vld [vmem:[#allocation8 + $0x318] sm:$0xff] }
  0xa7   :  { %427 = vmatpush.msrb.mxu1 %v395_v45  ;;  %447 = vmatpush.msrb.mxu2 %v364_v46  ;;  %v336_v45 = vld [vmem:[#allocation8 + $0x208] sm:$0xff] }
  0xa8   :  { %410 = vmatpush.msrb.mxu0 %v357_v56  ;;  %471 = vmatpush.msrb.mxu3 %v388_v63  ;;  %v368_v46 = vld [vmem:[#allocation8 + $0x308] sm:$0xff] }
  0xa9   :  { %428 = vmatpush.msrb.mxu1 %v393_v49  ;;  %448 = vmatpush.msrb.mxu2 %v362_v50 }
  0xaa   :  { %411 = vmatpush.msrb.mxu0 %v355_v60  ;;  %472 = vmatpush.msrb.mxu3 %v386_v9 }
  0xab   :  { %429 = vmatpush.msrb.mxu1 %v391_v53  ;;  %449 = vmatpush.msrb.mxu2 %v360_v54 }
  0xac   :  { %506 = vadd.xlane.f32.xlu2 %v505_v31  ;;  %412 = vmatpush.msrb.mxu0 %v353_v0  ;;  %v342_v31 = vld [vmem:[#allocation8 + $0x238] sm:$0xff] }
  0xad   :  { %430 = vmatpush.msrb.mxu1 %v389_v57  ;;  %450 = vmatpush.msrb.mxu2 %v358_v58 }
  0xae   :  { %413 = vmatpush.msrb.mxu0 %v351_v11  ;;  %473 = vmatpush.msrb.mxu3 %v384_v7  ;;  %v586_v7 = vld [vmem:[#allocation8 + $0x5f8] sm:$0xff] }
  0xaf   :  { %431 = vmatpush.msrb.mxu1 %v387_v61  ;;  %451 = vmatpush.msrb.mxu2 %v356_v62 }
  0xb0   :  { %414 = vmatpush.msrb.mxu0 %v349_v14  ;;  %474 = vmatpush.msrb.mxu3 %v382_v16  ;;  %v560_v16 = vld [vmem:[#allocation8 + $0x528] sm:$0xff] }
  0xb1   :  { %432 = vmatpush.msrb.mxu1 %v385_v1  ;;  %452 = vmatpush.msrb.mxu2 %v354_v8 }
  0xb2   :  { %415 = vmatpush.msrb.mxu0 %v347_v17  ;;  %475 = vmatpush.msrb.mxu3 %v380_v19  ;;  %v549_v17 = vld [vmem:[#allocation8 + $0x4d0] sm:$0xff]  ;;  %v550_v19 = vld [vmem:[#allocation8 + $0x4d8] sm:$0xff] }
  0xb3   :  { %433 = vmatpush.msrb.mxu1 %v383_v12  ;;  %453 = vmatpush.msrb.mxu2 %v352_v6  ;;  %v553_v12 = vld [vmem:[#allocation8 + $0x4f0] sm:$0xff] }
  0xb4   :  { %416 = vmatpush.msrb.mxu0 %v345_v20  ;;  %476 = vmatpush.msrb.mxu3 %v378_v23  ;;  %v585_v6 = vld [vmem:[#allocation8 + $0x5f0] sm:$0xff]  ;;  %v582_v20 = vld [vmem:[#allocation8 + $0x5d8] sm:$0xff] }
  0xb5   :  { %434 = vmatpush.msrb.mxu1 %v381_v15  ;;  %454 = vmatpush.msrb.mxu2 %v350_v3  ;;  %v551_v15 = vld [vmem:[#allocation8 + $0x4e0] sm:$0xff] }
  0xb6   :  { %417 = vmatpush.msrb.mxu0 %v343_v24  ;;  %477 = vmatpush.msrb.mxu3 %v376_v27  ;;  %v583_v3 = vld [vmem:[#allocation8 + $0x5e0] sm:$0xff]  ;;  %v548_v24 = vld [vmem:[#allocation8 + $0x4c8] sm:$0xff] }
  0xb7   :  { %435 = vmatpush.msrb.mxu1 %v379_v18  ;;  %455 = vmatpush.msrb.mxu2 %v348_v4  ;;  %v581_v18 = vld [vmem:[#allocation8 + $0x5d0] sm:$0xff] }
  0xb8   :  { %418 = vmatpush.msrb.mxu0 %v341_v28  ;;  %478 = vmatpush.msrb.mxu3 %v374_v32  ;;  %v546_v32 = vld [vmem:[#allocation8 + $0x4b8] sm:$0xff] }
  0xb9   :  { %436 = vmatpush.msrb.mxu1 %v377_v21  ;;  %456 = vmatpush.msrb.mxu2 %v346_v22  ;;  %v547_v21 = vld [vmem:[#allocation8 + $0x4c0] sm:$0xff] }
  0xba   :  { %419 = vmatpush.msrb.mxu0 %v339_v33  ;;  %479 = vmatpush.msrb.mxu3 %v372_v36  ;;  %v579_v22 = vld [vmem:[#allocation8 + $0x5c0] sm:$0xff]  ;;  %v578_v33 = vld [vmem:[#allocation8 + $0x5b8] sm:$0xff]  ;;  %v576_v36 = vld [vmem:[#allocation8 + $0x5a8] sm:$0xff] }
  0xbb   :  { %437 = vmatpush.msrb.mxu1 %v375_v25  ;;  %457 = vmatpush.msrb.mxu2 %v344_v26  ;;  %v580_v25 = vld [vmem:[#allocation8 + $0x5c8] sm:$0xff] }
  0xbc   :  { %420 = vmatpush.msrb.mxu0 %v337_v37  ;;  %480 = vmatpush.msrb.mxu3 %v370_v40  ;;  %v541_v37 = vld [vmem:[#allocation8 + $0x490] sm:$0xff]  ;;  %v574_v40 = vld [vmem:[#allocation8 + $0x598] sm:$0xff] }
  0xbd   :  { %438 = vmatpush.msrb.mxu1 %v373_v30  ;;  %458 = vmatpush.msrb.mxu2 %v342_v31  ;;  %v545_v30 = vld [vmem:[#allocation8 + $0x4b0] sm:$0xff] }
  0xbe   :  { %421 = vmatpush.msrb.mxu0 %v335_v41  ;;  %481 = vmatpush.msrb.mxu3 %v368_v46  ;;  %v577_v31 = vld [vmem:[#allocation8 + $0x5b0] sm:$0xff]  ;;  %v540_v46 = vld [vmem:[#allocation8 + $0x488] sm:$0xff] }
  0xbf   :  { %439 = vmatpush.msrb.mxu1 %v371_v34  ;;  %459 = vmatpush.msrb.mxu2 %v340_v35  ;;  %v544_v35 = vld [vmem:[#allocation8 + $0x4a8] sm:$0xff] }
  0xc1   :  { %440 = vmatpush.msrb.mxu1 %v369_v38  ;;  %460 = vmatpush.msrb.mxu2 %v338_v39  ;;  %v573_v38 = vld [vmem:[#allocation8 + $0x590] sm:$0xff]  ;;  %v542_v39 = vld [vmem:[#allocation8 + $0x498] sm:$0xff] }
  0xc3   :  { %441 = vmatpush.msrb.mxu1 %v367_v44  ;;  %461 = vmatpush.msrb.mxu2 %v336_v45  ;;  %v539_v44 = vld [vmem:[#allocation8 + $0x480] sm:$0xff] }
  0xc4   :  { %v571_v45 = vld [vmem:[#allocation8 + $0x580] sm:$0xff] }
 0x10f   :  { %v135_v47 = vpop.xlane.xlu1 %134 }
 0x110   :  { %v136_v48 = vmul.f32 %v135_v47, %v1097_v29  ;;  %v572_v47 = vld [vmem:[#allocation8 + $0x588] sm:$0xff] }
 0x112   :  { %v137_v49 = vadd.f32 1e-05, %v136_v48  ;;  %v537_v48 = vld [vmem:[#allocation8 + $0x470] sm:$0xff] }
 0x114   :  { %754 = vrsqrt.f32 %v137_v49  ;;  %vm144_vm2 = vweird.f32 %v137_v49 }
 0x117   :  { %v319_v50 = vpop.xlane.xlu2 %318 }
 0x118   :  { %v320_v51 = vmul.f32 %v319_v50, %v1097_v29  ;;  %v538_v50 = vld [vmem:[#allocation8 + $0x478] sm:$0xff] }
 0x11a   :  { %v755_v52 = vpop.eup %754  ;;  %v321_v53 = vadd.f32 1e-05, %v320_v51  ;;  %v570_v51 = vld [vmem:[#allocation8 + $0x578] sm:$0xff] }
 0x11b   :  { %v139_v54 = vmul.f32 %v755_v52, %v137_v49  ;;  %vm145_vm1 = vweird.f32 %v755_v52  ;;  %v569_v49 = vld [vmem:[#allocation8 + $0x570] sm:$0xff] }
 0x11c   :  { %756 = vrsqrt.f32 %v321_v53  ;;  %vm146_vm3 = vmor %vm144_vm2, %vm145_vm1  ;;  %vm328_vm4 = vweird.f32 %v321_v53 }
 0x11d   :  { %v140_v55 = vmul.f32 %v755_v52, %v139_v54  ;;  %v567_v54 = vld [vmem:[#allocation8 + $0x560] sm:$0xff] }
 0x11f   :  { %v141_v56 = vmul.f32 0.5, %v140_v55  ;;  %v507_v57 = vpop.xlane.xlu2 %506  ;;  %v536_v55 = vld [vmem:[#allocation8 + $0x468] sm:$0xff] }
 0x120   :  { %v508_v60 = vmul.f32 %v507_v57, %v1097_v29  ;;  %v554_v29 = vld [vmem:[#allocation8 + $0x4f8] sm:$0xff]  ;;  %v533_v57 = vld [vmem:[#allocation8 + $0x450] sm:$0xff] }
 0x121   :  { %v142_v58 = vsub.f32 1.5, %v141_v56  ;;  %v568_v56 = vld [vmem:[#allocation8 + $0x568] sm:$0xff] }
 0x122   :  { %v757_v59 = vpop.eup %756  ;;  %v1135_v1 = vadd.f32 1e-05, %v508_v60  ;;  %v566_v60 = vld [vmem:[#allocation8 + $0x558] sm:$0xff] }
 0x123   :  { %v323_v61 = vmul.f32 %v757_v59, %v321_v53  ;;  %v143_v62 = vmul.f32 %v755_v52, %v142_v58  ;;  %vm329_vm5 = vweird.f32 %v757_v59  ;;  %v535_v53 = vld [vmem:[#allocation8 + $0x460] sm:$0xff]  ;;  %v565_v58 = vld [vmem:[#allocation8 + $0x550] sm:$0xff] }
 0x124   :  { %vm1139_vm6 = vmor %vm328_vm4, %vm329_vm5  ;;  %758 = vrsqrt.f32 %v1135_v1  ;;  %vm516_vm7 = vweird.f32 %v1135_v1 }
 0x125   :  { %v324_v63 = vmul.f32 %v757_v59, %v323_v61  ;;  %v147_v0 = vsel %vm146_vm3, %v755_v52, %v143_v62  ;;  %v531_v62 = vld [vmem:[#allocation8 + $0x440] sm:$0xff] }
 0x126   :  { %v148_v8 = vmul.f32 %v147_v0, %v1101_v42  ;;  %v149_v9 = vmul.f32 %v147_v0, %v1104_v43  ;;  %v552_v42 = vld [vmem:[#allocation8 + $0x4e8] sm:$0xff] }
 0x127   :  { %v325_v11 = vmul.f32 0.5, %v324_v63  ;;  %v584_v43 = vld [vmem:[#allocation8 + $0x5e8] sm:$0xff]  ;;  %v563_v63 = vld [vmem:[#allocation8 + $0x540] sm:$0xff] }
 0x128   :  { %236 = vmatmul.f32.vlgmr.msra.gmra.mxu0 %v148_v8  ;;  %256 = vmatmul.f32.vlgmr.msra.gmra.mxu1 %v149_v9  ;;  %v532_v0 = vld [vmem:[#allocation8 + $0x448] sm:$0xff] }
 0x129   :  { %v326_v14 = vsub.f32 1.5, %v325_v11  ;;  %276 = vmatmul.f32.vlgmr.msra.gmra.mxu2 %v148_v8  ;;  %296 = vmatmul.f32.vlgmr.msra.gmra.mxu3 %v149_v9  ;;  %v564_v8 = vld [vmem:[#allocation8 + $0x548] sm:$0xff]  ;;  %v529_v9 = vld [vmem:[#allocation8 + $0x430] sm:$0xff] }
 0x12a   :  { %594 = vmatpush.msra.mxu0 %v553_v12  ;;  %614 = vmatpush.msra.mxu1 %v585_v6  ;;  %v1148_v28 = vpop.eup %758  ;;  %v561_v11 = vld [vmem:[#allocation8 + $0x530] sm:$0xff]  ;;  %v530_v12 = vld [vmem:[#allocation8 + $0x438] sm:$0xff] }
 0x12b   :  { %634 = vmatpush.msra.mxu2 %v554_v29  ;;  %654 = vmatpush.msra.mxu3 %v586_v7  ;;  %v327_v4 = vmul.f32 %v757_v59, %v326_v14  ;;  %v511_v34 = vmul.f32 %v1148_v28, %v1135_v1  ;;  %vm517_vm8 = vweird.f32 %v1148_v28  ;;  %v562_v6 = vld [vmem:[#allocation8 + $0x538] sm:$0xff]  ;;  %v527_v7 = vld [vmem:[#allocation8 + $0x420] sm:$0xff] }
 0x12c   :  { %595 = vmatpush.msra.mxu0 %v551_v15  ;;  %615 = vmatpush.msra.mxu1 %v583_v3  ;;  %v559_v14 = vld [vmem:[#allocation8 + $0x520] sm:$0xff]  ;;  %vm1158_vm9 = vmor %vm516_vm7, %vm517_vm8  ;;  %v528_v3 = vld [vmem:[#allocation8 + $0x428] sm:$0xff] }
 0x12d   :  { %635 = vmatpush.msra.mxu2 %v552_v42  ;;  %655 = vmatpush.msra.mxu3 %v584_v43  ;;  %v331_v23 = vsel %vm1139_vm6, %v757_v59, %v327_v4  ;;  %v512_v41 = vmul.f32 %v1148_v28, %v511_v34  ;;  %v534_v59 = vld [vmem:[#allocation8 + $0x458] sm:$0xff]  ;;  %v525_v42 = vld [vmem:[#allocation8 + $0x410] sm:$0xff]  ;;  %v523_v4 = vld [vmem:[#allocation8 + $0x400] sm:$0xff] }
 0x12e   :  { %596 = vmatpush.msra.mxu0 %v549_v17  ;;  %616 = vmatpush.msra.mxu1 %v581_v18  ;;  %v332_v26 = vmul.f32 %v331_v23, %v1113_v2  ;;  %v333_v27 = vmul.f32 %v331_v23, %v1116_v5  ;;  %v543_v2 = vld [vmem:[#allocation8 + $0x4a0] sm:$0xff]  ;;  %v557_v43 = vld [vmem:[#allocation8 + $0x510] sm:$0xff]  ;;  %v526_v17 = vld [vmem:[#allocation8 + $0x418] sm:$0xff] }
 0x12f   :  { %636 = vmatpush.msra.mxu2 %v550_v19  ;;  %656 = vmatpush.msra.mxu3 %v582_v20  ;;  %v575_v5 = vld [vmem:[#allocation8 + $0x5a0] sm:$0xff]  ;;  %v513_v52 = vmul.f32 0.5, %v512_v41  ;;  %v558_v18 = vld [vmem:[#allocation8 + $0x518] sm:$0xff]  ;;  %v524_v20 = vld [vmem:[#allocation8 + $0x408] sm:$0xff] }
 0x130   :  { %597 = vmatpush.msra.mxu0 %v547_v21  ;;  %617 = vmatpush.msra.mxu1 %v579_v22  ;;  %v555_v1 = vld [vmem:[#allocation8 + $0x500] sm:$0xff]  ;;  %v556_v21 = vld [vmem:[#allocation8 + $0x508] sm:$0xff] }
 0x131   :  { %637 = vmatpush.msra.mxu2 %v548_v24  ;;  %657 = vmatpush.msra.mxu3 %v580_v25  ;;  %v514_v61 = vsub.f32 1.5, %v513_v52  ;;  %v214_v24 = vld [vmem:[#allocation10] sm:$0x3] }
 0x132   :  { %422 = vmatmul.f32.vlgmr.msrb.gmra.mxu0 %v332_v26  ;;  %442 = vmatmul.f32.vlgmr.msrb.gmra.mxu1 %v333_v27  ;;  %v216_v25 = vperm.slane %v214_v24, 0 }
 0x133   :  { %462 = vmatmul.f32.vlgmr.msrb.gmra.mxu2 %v332_v26  ;;  %482 = vmatmul.f32.vlgmr.msrb.gmra.mxu3 %v333_v27  ;;  %v515_v29 = vmul.f32 %v1148_v28, %v514_v61 }
 0x134   :  { %598 = vmatpush.msra.mxu0 %v545_v30  ;;  %618 = vmatpush.msra.mxu1 %v577_v31  ;;  %v217_v31 = vperm.slane %v214_v24, 1 }
 0x135   :  { %638 = vmatpush.msra.mxu2 %v546_v32  ;;  %658 = vmatpush.msra.mxu3 %v578_v33  ;;  %v519_v19 = vsel %vm1158_vm9, %v1148_v28, %v515_v29  ;;  %v400_v32 = vld [vmem:[#allocation10 + $0x2] sm:$0x3] }
 0x136   :  { %599 = vmatpush.msra.mxu0 %v543_v2  ;;  %619 = vmatpush.msra.mxu1 %v575_v5  ;;  %v520_v22 = vmul.f32 %v519_v19, %v1119_v10  ;;  %v521_v23 = vmul.f32 %v519_v19, %v1122_v13  ;;  %v402_v34 = vperm.slane %v400_v32, 0 }
 0x137   :  { %639 = vmatpush.msra.mxu2 %v544_v35  ;;  %659 = vmatpush.msra.mxu3 %v576_v36 }
 0x138   :  { %600 = vmatpush.msra.mxu0 %v541_v37  ;;  %620 = vmatpush.msra.mxu1 %v573_v38 }
 0x139   :  { %640 = vmatpush.msra.mxu2 %v542_v39  ;;  %660 = vmatpush.msra.mxu3 %v574_v40  ;;  %v403_v39 = vperm.slane %v400_v32, 1 }
 0x13a   :  { %601 = vmatpush.msra.mxu0 %v539_v44  ;;  %621 = vmatpush.msra.mxu1 %v571_v45 }
 0x13b   :  { %641 = vmatpush.msra.mxu2 %v540_v46  ;;  %661 = vmatpush.msra.mxu3 %v572_v47 }
 0x13c   :  { %602 = vmatpush.msra.mxu0 %v537_v48  ;;  %622 = vmatpush.msra.mxu1 %v569_v49  ;;  %v588_v49 = vld [vmem:[#allocation10 + $0x4] sm:$0x3] }
 0x13d   :  { %642 = vmatpush.msra.mxu2 %v538_v50  ;;  %662 = vmatpush.msra.mxu3 %v570_v51  ;;  %v590_v50 = vperm.slane %v588_v49, 0 }
 0x13e   :  { %603 = vmatpush.msra.mxu0 %v535_v53  ;;  %623 = vmatpush.msra.mxu1 %v567_v54 }
 0x13f   :  { %643 = vmatpush.msra.mxu2 %v536_v55  ;;  %663 = vmatpush.msra.mxu3 %v568_v56  ;;  %v591_v55 = vperm.slane %v588_v49, 1 }
 0x140   :  { %604 = vmatpush.msra.mxu0 %v533_v57  ;;  %624 = vmatpush.msra.mxu1 %v565_v58 }
 0x141   :  { %644 = vmatpush.msra.mxu2 %v534_v59  ;;  %664 = vmatpush.msra.mxu3 %v566_v60 }
 0x142   :  { %605 = vmatpush.msra.mxu0 %v531_v62  ;;  %625 = vmatpush.msra.mxu1 %v563_v63 }
 0x143   :  { %645 = vmatpush.msra.mxu2 %v532_v0  ;;  %665 = vmatpush.msra.mxu3 %v564_v8 }
 0x144   :  { %606 = vmatpush.msra.mxu0 %v529_v9  ;;  %626 = vmatpush.msra.mxu1 %v561_v11 }
 0x145   :  { %646 = vmatpush.msra.mxu2 %v530_v12  ;;  %666 = vmatpush.msra.mxu3 %v562_v6 }
 0x146   :  { %607 = vmatpush.msra.mxu0 %v527_v7  ;;  %627 = vmatpush.msra.mxu1 %v559_v14 }
 0x147   :  { %647 = vmatpush.msra.mxu2 %v528_v3  ;;  %667 = vmatpush.msra.mxu3 %v560_v16 }
 0x148   :  { %608 = vmatpush.msra.mxu0 %v525_v42  ;;  %628 = vmatpush.msra.mxu1 %v557_v43 }
 0x149   :  { %648 = vmatpush.msra.mxu2 %v526_v17  ;;  %668 = vmatpush.msra.mxu3 %v558_v18 }
 0x14a   :  { %609 = vmatpush.msra.mxu0 %v523_v4  ;;  %629 = vmatpush.msra.mxu1 %v555_v1 }
 0x14b   :  { %649 = vmatpush.msra.mxu2 %v524_v20  ;;  %669 = vmatpush.msra.mxu3 %v556_v21 }
 0x14c   :  { %610 = vmatmul.f32.vlgmr.msra.gmra.mxu0 %v520_v22  ;;  %630 = vmatmul.f32.vlgmr.msra.gmra.mxu1 %v521_v23 }
 0x14d   :  { %650 = vmatmul.f32.vlgmr.msra.gmra.mxu2 %v520_v22  ;;  %670 = vmatmul.f32.vlgmr.msra.gmra.mxu3 %v521_v23 }
 0x1a5   :  { %v237_v26 = vpop.f32.mrf.mxu0  ;;  %v257_v28 = vpop.f32.mrf.mxu1 }
 0x1a6   :  { %v238_v27 = vadd.f32 %v237_v26, %v216_v25 }
 0x1a8   :  { %v258_v30 = vadd.f32 %v257_v28, %v238_v27 }
 0x1aa   :  { %760 = vtanh.f32 %v258_v30 }
 0x1ac   :  { %v277_v33 = vpop.f32.mrf.mxu2  ;;  %v297_v2 = vpop.f32.mrf.mxu3 }
 0x1ad   :  { %v278_v10 = vadd.f32 %v277_v33, %v217_v31 }
 0x1af   :  { %v298_v13 = vadd.f32 %v297_v2, %v278_v10  ;;  %v423_v5 = vpop.f32.mrf.mxu0  ;;  %v443_v37 = vpop.f32.mrf.mxu1 }
 0x1b0   :  { %v761_v35 = vpop.eup %760  ;;  %v424_v36 = vadd.f32 %v423_v5, %v402_v34 }
 0x1b1   :  { %302 = vst [vmem:[#allocation13] sm:$0xff] %v761_v35  ;;  %762 = vtanh.f32 %v298_v13 }
 0x1b2   :  { %304 = vst [vmem:[#allocation14] sm:$0xff] %v761_v35  ;;  %v444_v38 = vadd.f32 %v443_v37, %v424_v36 }
 0x1b4   :  { %764 = vtanh.f32 %v444_v38 }
 0x1b6   :  { %v463_v40 = vpop.f32.mrf.mxu2  ;;  %v483_v45 = vpop.f32.mrf.mxu3 }
 0x1b7   :  { %v763_v41 = vpop.eup %762  ;;  %v464_v44 = vadd.f32 %v463_v40, %v403_v39 }
 0x1b8   :  { %303 = vst [vmem:[#allocation13 + $0x18] sm:$0xff] %v763_v41 }
 0x1b9   :  { %305 = vst [vmem:[#allocation14 + $0x18] sm:$0xff] %v763_v41  ;;  %v484_v46 = vadd.f32 %v483_v45, %v464_v44 }
 0x1ba   :  { %v765_v47 = vpop.eup %764 }
 0x1bb   :  { %488 = vst [vmem:[#allocation13 + $0x8] sm:$0xff] %v765_v47  ;;  %766 = vtanh.f32 %v484_v46  ;;  %v493_v60 = vadd.f32 %v765_v47, %v761_v35 }
 0x1bc   :  { %490 = vst [vmem:[#allocation14 + $0x8] sm:$0xff] %v765_v47 }
 0x1c1   :  { %v767_v48 = vpop.eup %766 }
 0x1c2   :  { %489 = vst [vmem:[#allocation13 + $0x20] sm:$0xff] %v767_v48 }
 0x1c3   :  { %491 = vst [vmem:[#allocation14 + $0x20] sm:$0xff] %v767_v48 }
 0x1c9   :  { %v611_v51 = vpop.f32.mrf.mxu0  ;;  %v631_v53 = vpop.f32.mrf.mxu1 }
 0x1ca   :  { %v612_v52 = vadd.f32 %v611_v51, %v590_v50 }
 0x1cc   :  { %v632_v54 = vadd.f32 %v631_v53, %v612_v52 }
 0x1ce   :  { %768 = vtanh.f32 %v632_v54 }
 0x1d0   :  { %v651_v56 = vpop.f32.mrf.mxu2  ;;  %v671_v58 = vpop.f32.mrf.mxu3 }
 0x1d1   :  { %v652_v57 = vadd.f32 %v651_v56, %v591_v55 }
 0x1d3   :  { %v672_v59 = vadd.f32 %v671_v58, %v652_v57 }
 0x1d4   :  { %v769_v61 = vpop.eup %768 }
 0x1d5   :  { %676 = vst [vmem:[#allocation13 + $0x10] sm:$0xff] %v769_v61  ;;  %770 = vtanh.f32 %v672_v59  ;;  %v681_v62 = vadd.f32 %v769_v61, %v493_v60 }
 0x1d6   :  { %678 = vst [vmem:[#allocation14 + $0x10] sm:$0xff] %v769_v61 }
 0x1d7   :  { %682 = vst [vmem:[#allocation16] sm:$0xff] %v681_v62 }
 0x1db   :  { %v771_v63 = vpop.eup %770 }
 0x1dc   :  { %677 = vst [vmem:[#allocation13 + $0x28] sm:$0xff] %v771_v63 }
 0x1dd   :  { %679 = vst [vmem:[#allocation14 + $0x28] sm:$0xff] %v771_v63  ;;  %693 = dma.vmem_to_hbm [thread:$0]  %s689_s17, 768, %s691_s19, [#allocation4]  }
 0x1de   :  { %706 = dma.vmem_to_hbm [thread:$0]  %s699_s5, 768, %s701_s15, [#allocation15], %s1014_s7, %s1014_s7, %s1015_s24  }
 0x1df   :  { %717 = dma.vmem_to_hbm [thread:$0]  %s713_s21, 128, %s715_s23, [#allocation15]  }
 0x1e0   :  { %996 = dma.done.wait [#allocation4], 768  }
 0x1e1   :  { %997 = vsyncadd [#allocation4], 4294966528 }
 0x1e2   :  { %998 = dma.done.wait [#allocation15], 896  }
 0x1e3   :  { %999 = vsyncadd [#allocation15], 4294966400 }
 0x1e4   :  { %730 = vsyncpa [#allocation3], 1 }
 0x1e5   :  { %731 = vsyncpa [#allocation6], 1 }
 0x1e6   :  { %732 = vsyncpa [#allocation9], 1 }
 0x1e7   :  { %733 = vsyncpa [#allocation12], 1 }
 0x1e8   :  { %734 = vsyncpa [#allocation4], 1 }
 0x1e9   :  { %735 = vsyncpa [#allocation15], 1 }

</bundles_post_ra>
